<compile_context>
chip_gen: v5e
topology: v5e:2x2
jax: 0.10.0
libtpu: 0.0.40
codegen_flags: <defaults>
</compile_context>

<pallas_src>
import jax
import jax.numpy as jnp
from jax.experimental import pallas as pl
from jax.experimental.pallas import tpu as pltpu

LANE = 128
SUBLANE = 8


def mlp_kernel(x_ref, w1_ref, b1_ref, w2_ref, b2_ref, w3_ref, b3_ref, o_ref):
    # Hidden layer 1: Linear + ReLU (f32 accumulation on the MXU).
    h1 = jnp.dot(x_ref[...], w1_ref[...], preferred_element_type=jnp.float32)
    h1 = jnp.maximum(h1 + b1_ref[...], 0.0)
    # Hidden layer 2: Linear + ReLU.
    h2 = jnp.dot(h1, w2_ref[...], preferred_element_type=jnp.float32)
    h2 = jnp.maximum(h2 + b2_ref[...], 0.0)
    # Output layer: Linear (logits, no activation). Output block is (tb, F_out) with
    # F_out == full array dim; the masked vst cost at small F_out is negligible and we
    # avoid writing (and later re-reading) a 128-lane padded slab to HBM.
    logits = jnp.dot(h2, w3_ref[...], preferred_element_type=jnp.float32) + b3_ref[...]
    o_ref[...] = logits.astype(o_ref.dtype)


def _round_up(x, m):
    return ((x + m - 1) // m) * m


def _pick_batch_tile(B):
    """Choose a batch tile. Returns (tile, padded_batch)."""
    if B <= 256:
        # Tiny problem: one block, grid=(1,), no padding, no extra HLOs around the call.
        return B, B
    if B <= 2048:
        # Mid-size: exactly 2 grid steps so v7x's second TensorCore is used
        # ("parallel" only shards when n_tiles > 1); harmless on v5e/v6e.
        tb = _round_up((B + 1) // 2, SUBLANE)
        return tb, 2 * tb
    # Large B: big tiles (~a few MB double-buffered) amortize the ~0.35 us/step
    # pipeline overhead while staying far below any VMEM limit.
    if B >= 16384:
        tb = 8192
    elif B >= 8192:
        tb = 4096
    else:
        tb = 2048
    return tb, _round_up(B, tb)


def mlp_forward(x, params, *, batch_tile=None):
    """Fused 3-layer MLP forward. x: (B, F_in) -> logits: (B, F_out)."""
    w1, b1, w2, b2, w3, b3 = params
    B, F_in = x.shape
    hidden = w1.shape[1]
    F_out = w3.shape[1]

    if batch_tile is not None:
        tb, B_pad = batch_tile, _round_up(B, batch_tile)
    else:
        tb, B_pad = _pick_batch_tile(B)
    n_tiles = B_pad // tb

    # On the tiled (non-tiny) path, zero-pad the hidden dim up to 128 lanes so every
    # MXU tile has lane-aligned K/N (avoids masked ops / relayouts between the chained
    # dots). Zero columns/rows + zero bias keep the logits bit-identical. The input
    # feature dim is NOT padded (that would inflate the dominant x HBM read traffic).
    if n_tiles > 1 and hidden % LANE != 0:
        hp = _round_up(hidden, LANE) - hidden
        w1 = jnp.pad(w1, ((0, 0), (0, hp)))
        b1 = jnp.pad(b1, ((0, 0), (0, hp)))
        w2 = jnp.pad(w2, ((0, hp), (0, hp)))
        b2 = jnp.pad(b2, ((0, 0), (0, hp)))
        w3 = jnp.pad(w3, ((0, hp), (0, 0)))

    # Ragged batch: pad rows (zeros) up to a tile multiple; slice the output back.
    if B_pad != B:
        x = jnp.pad(x, ((0, B_pad - B), (0, 0)))

    # Weights/biases are tiny: keep them whole-array resident in VMEM (no per-step
    # blocking / DMA bookkeeping).
    resident = pl.BlockSpec(memory_space=pltpu.MemorySpace.VMEM)

    # Explicit VMEM budget: double-buffered x/out tiles + resident weights + headroom,
    # clamped to 32 MiB (comfortable within v7x's 64 MiB physical VMEM).
    weight_bytes = sum(int(a.size) * a.dtype.itemsize for a in (w1, b1, w2, b2, w3, b3))
    tile_bytes = 2 * tb * (F_in + F_out) * 4
    vmem_limit = int(min(max(tile_bytes + weight_bytes + (4 << 20), 16 << 20), 32 << 20))

    out = pl.pallas_call(
        mlp_kernel,
        out_shape=jax.ShapeDtypeStruct((B_pad, F_out), x.dtype),
        grid=(n_tiles,),
        in_specs=[
            pl.BlockSpec((tb, F_in), lambda i: (i, 0)),   # batch-tiled activations
            resident, resident,                           # w1, b1
            resident, resident,                           # w2, b2
            resident, resident,                           # w3, b3
        ],
        out_specs=pl.BlockSpec((tb, F_out), lambda i: (i, 0)),
        compiler_params=pltpu.CompilerParams(
            # Batch axis is fully independent: "parallel" lets v7x shard grid steps
            # across its 2 TensorCores when n_tiles > 1 (no effect at grid=(1,)).
            dimension_semantics=("parallel",),
            vmem_limit_bytes=vmem_limit,
        ),
    )(x, w1, b1, w2, b2, w3, b3)

    if B_pad != B:
        out = out[:B]
    return out


def init_params(key, input_features, output_features, hidden_units=8):
    """Deterministic init mimicking nn.Linear's uniform(-1/sqrt(fan_in), 1/sqrt(fan_in))."""
    def linear(key, fan_in, fan_out):
        kw, kb = jax.random.split(key)
        bound = 1.0 / jnp.sqrt(jnp.float32(fan_in))
        w = jax.random.uniform(kw, (fan_in, fan_out), jnp.float32, -bound, bound)
        b = jax.random.uniform(kb, (1, fan_out), jnp.float32, -bound, bound)
        return w, b

    k1, k2, k3 = jax.random.split(key, 3)
    w1, b1 = linear(k1, input_features, hidden_units)
    w2, b2 = linear(k2, hidden_units, hidden_units)
    w3, b3 = linear(k3, hidden_units, output_features)
    return (w1, b1, w2, b2, w3, b3)


def mlp_reference(x, params):
    w1, b1, w2, b2, w3, b3 = params
    h1 = jnp.maximum(x @ w1 + b1, 0.0)
    h2 = jnp.maximum(h1 @ w2 + b2, 0.0)
    return h2 @ w3 + b3


if __name__ == "__main__":
    # Small shapes consistent with the module: 12 input features, 8 hidden units
    # (default), 4 output classes.
    input_features = 12
    hidden_units = 8
    output_features = 4

    key = jax.random.PRNGKey(0)
    kx, kp, kx2 = jax.random.split(key, 3)
    params = init_params(kp, input_features, output_features, hidden_units)

    # Case 1: tiny batch (B=16) -> single block, grid=(1,), no padding HLOs.
    x_small = jax.random.normal(kx, (16, input_features), dtype=jnp.float32)
    logits_small = jax.block_until_ready(mlp_forward(x_small, params))
    ref_small = mlp_reference(x_small, params)
    assert logits_small.shape == (16, output_features)
    assert jnp.allclose(logits_small, ref_small, atol=1e-5, rtol=1e-5), "small-batch mismatch"

    # Case 2: ragged mid-size batch (B=1000) -> 2 grid steps (v7x megacore path),
    # hidden padded to 128 lanes, batch padded to a tile multiple and sliced back.
    x_mid = jax.random.normal(kx2, (1000, input_features), dtype=jnp.float32)
    logits_mid = jax.block_until_ready(mlp_forward(x_mid, params))
    ref_mid = mlp_reference(x_mid, params)
    assert logits_mid.shape == (1000, output_features)
    assert jnp.allclose(logits_mid, ref_mid, atol=1e-5, rtol=1e-5), "mid-batch mismatch"

    print("KERNEL_OK")
</pallas_src>

<mosaic_0001>
module attributes {stable_mosaic.version = 11 : i64} {
  func.func @mlp_kernel(%arg0: i32, %arg1: memref<16x12xf32, #tpu.memory_space<vmem>>, %arg2: memref<12x8xf32, #tpu.memory_space<vmem>>, %arg3: memref<1x8xf32, #tpu.memory_space<vmem>>, %arg4: memref<8x8xf32, #tpu.memory_space<vmem>>, %arg5: memref<1x8xf32, #tpu.memory_space<vmem>>, %arg6: memref<8x4xf32, #tpu.memory_space<vmem>>, %arg7: memref<1x4xf32, #tpu.memory_space<vmem>>, %arg8: memref<16x4xf32, #tpu.memory_space<vmem>>) attributes {dimension_semantics = [#tpu.dimension_semantics<parallel>], iteration_bounds = array<i64: 1>, scalar_prefetch = 0 : i64, scratch_operands = 0 : i64, tpu.core_type = #tpu.core_type<tc>, window_params = [{transform_indices = @transform_0, window_bounds = array<i64: 16, 12>}, {pipeline_mode = #tpu.pipeline_mode<synchronous>, transform_indices = @transform_1, window_bounds = array<i64: 12, 8>}, {pipeline_mode = #tpu.pipeline_mode<synchronous>, transform_indices = @transform_2, window_bounds = array<i64: 1, 8>}, {pipeline_mode = #tpu.pipeline_mode<synchronous>, transform_indices = @transform_3, window_bounds = array<i64: 8, 8>}, {pipeline_mode = #tpu.pipeline_mode<synchronous>, transform_indices = @transform_4, window_bounds = array<i64: 1, 8>}, {pipeline_mode = #tpu.pipeline_mode<synchronous>, transform_indices = @transform_5, window_bounds = array<i64: 8, 4>}, {pipeline_mode = #tpu.pipeline_mode<synchronous>, transform_indices = @transform_6, window_bounds = array<i64: 1, 4>}, {transform_indices = @transform_7, window_bounds = array<i64: 16, 4>}]} {
    %c0 = arith.constant 0 : index
    %c0_0 = arith.constant 0 : index
    %0 = vector.load %arg1[%c0, %c0_0] : memref<16x12xf32, #tpu.memory_space<vmem>>, vector<16x12xf32>
    %c0_1 = arith.constant 0 : index
    %c0_2 = arith.constant 0 : index
    %1 = vector.load %arg2[%c0_1, %c0_2] : memref<12x8xf32, #tpu.memory_space<vmem>>, vector<12x8xf32>
    %cst = arith.constant dense<0.000000e+00> : vector<16x8xf32>
    %2 = tpu.matmul %0, %1, %cst {dimension_numbers = #tpu.dot_dimension_numbers<[1], [0], [0], [1], [0, 0, 1, 1], [], []>} : vector<16x12xf32>, vector<12x8xf32>, vector<16x8xf32> -> vector<16x8xf32>
    %c0_3 = arith.constant 0 : index
    %c0_4 = arith.constant 0 : index
    %3 = vector.load %arg3[%c0_3, %c0_4] : memref<1x8xf32, #tpu.memory_space<vmem>>, vector<1x8xf32>
    %4 = vector.broadcast %3 : vector<1x8xf32> to vector<16x8xf32>
    %5 = arith.addf %2, %4 : vector<16x8xf32>
    %cst_5 = arith.constant 0.000000e+00 : f32
    %6 = vector.broadcast %cst_5 : f32 to vector<16x8xf32>
    %7 = arith.maximumf %5, %6 : vector<16x8xf32>
    %c0_6 = arith.constant 0 : index
    %c0_7 = arith.constant 0 : index
    %8 = vector.load %arg4[%c0_6, %c0_7] : memref<8x8xf32, #tpu.memory_space<vmem>>, vector<8x8xf32>
    %cst_8 = arith.constant dense<0.000000e+00> : vector<16x8xf32>
    %9 = tpu.matmul %7, %8, %cst_8 {dimension_numbers = #tpu.dot_dimension_numbers<[1], [0], [0], [1], [0, 0, 1, 1], [], []>} : vector<16x8xf32>, vector<8x8xf32>, vector<16x8xf32> -> vector<16x8xf32>
    %c0_9 = arith.constant 0 : index
    %c0_10 = arith.constant 0 : index
    %10 = vector.load %arg5[%c0_9, %c0_10] : memref<1x8xf32, #tpu.memory_space<vmem>>, vector<1x8xf32>
    %11 = vector.broadcast %10 : vector<1x8xf32> to vector<16x8xf32>
    %12 = arith.addf %9, %11 : vector<16x8xf32>
    %cst_11 = arith.constant 0.000000e+00 : f32
    %13 = vector.broadcast %cst_11 : f32 to vector<16x8xf32>
    %14 = arith.maximumf %12, %13 : vector<16x8xf32>
    %c0_12 = arith.constant 0 : index
    %c0_13 = arith.constant 0 : index
    %15 = vector.load %arg6[%c0_12, %c0_13] : memref<8x4xf32, #tpu.memory_space<vmem>>, vector<8x4xf32>
    %cst_14 = arith.constant dense<0.000000e+00> : vector<16x4xf32>
    %16 = tpu.matmul %14, %15, %cst_14 {dimension_numbers = #tpu.dot_dimension_numbers<[1], [0], [0], [1], [0, 0, 1, 1], [], []>} : vector<16x8xf32>, vector<8x4xf32>, vector<16x4xf32> -> vector<16x4xf32>
    %c0_15 = arith.constant 0 : index
    %c0_16 = arith.constant 0 : index
    %17 = vector.load %arg7[%c0_15, %c0_16] : memref<1x4xf32, #tpu.memory_space<vmem>>, vector<1x4xf32>
    %18 = vector.broadcast %17 : vector<1x4xf32> to vector<16x4xf32>
    %19 = arith.addf %16, %18 : vector<16x4xf32>
    %c0_17 = arith.constant 0 : index
    %c0_18 = arith.constant 0 : index
    %20 = vector.load %arg8[%c0_17, %c0_18] : memref<16x4xf32, #tpu.memory_space<vmem>>, vector<16x4xf32>
    tpu.vector_store %arg8[%c0_17, %c0_18], %19 {strides = array<i32>} : memref<16x4xf32, #tpu.memory_space<vmem>>, vector<16x4xf32>,
    return
  }
  func.func @transform_0(%arg0: i32) -> (i32, i32) {
    %c0_i32 = arith.constant 0 : i32
    %c0_i32_0 = arith.constant 0 : i32
    return %arg0, %c0_i32 : i32, i32
  }
  func.func @transform_1(%arg0: i32) -> (i32, i32) {
    %c0_i32 = arith.constant 0 : i32
    %c0_i32_0 = arith.constant 0 : i32
    %c0_i32_1 = arith.constant 0 : i32
    return %c0_i32, %c0_i32_0 : i32, i32
  }
  func.func @transform_2(%arg0: i32) -> (i32, i32) {
    %c0_i32 = arith.constant 0 : i32
    %c0_i32_0 = arith.constant 0 : i32
    %c0_i32_1 = arith.constant 0 : i32
    return %c0_i32, %c0_i32_0 : i32, i32
  }
  func.func @transform_3(%arg0: i32) -> (i32, i32) {
    %c0_i32 = arith.constant 0 : i32
    %c0_i32_0 = arith.constant 0 : i32
    %c0_i32_1 = arith.constant 0 : i32
    return %c0_i32, %c0_i32_0 : i32, i32
  }
  func.func @transform_4(%arg0: i32) -> (i32, i32) {
    %c0_i32 = arith.constant 0 : i32
    %c0_i32_0 = arith.constant 0 : i32
    %c0_i32_1 = arith.constant 0 : i32
    return %c0_i32, %c0_i32_0 : i32, i32
  }
  func.func @transform_5(%arg0: i32) -> (i32, i32) {
    %c0_i32 = arith.constant 0 : i32
    %c0_i32_0 = arith.constant 0 : i32
    %c0_i32_1 = arith.constant 0 : i32
    return %c0_i32, %c0_i32_0 : i32, i32
  }
  func.func @transform_6(%arg0: i32) -> (i32, i32) {
    %c0_i32 = arith.constant 0 : i32
    %c0_i32_0 = arith.constant 0 : i32
    %c0_i32_1 = arith.constant 0 : i32
    return %c0_i32, %c0_i32_0 : i32, i32
  }
  func.func @transform_7(%arg0: i32) -> (i32, i32) {
    %c0_i32 = arith.constant 0 : i32
    %c0_i32_0 = arith.constant 0 : i32
    return %arg0, %c0_i32 : i32, i32
  }
}

</mosaic_0001>

<bundles_post_ra>
// kernel: tpu_custom_call.1
= control target key start
LH: loop header
LB: loop body
LE: loop exit
PB: predicated region body
PF: predicated region fallthrough
CT: control target
= control target key end

     0   :  { %vm41_vm0 = vcmask 1043456   ;;  %vm34_vm1 = vcmask 97280   ;;  %vm75_vm2 = vcmask 64512   ;;  %vm141_vm3 = vcmask 31744   ;;  %s237_s1 = inlined_call_operand.vmem [shape: f32[12,8], index: 1, kind: input, shape index: {}]   ;;  %s238_s0 = inlined_call_operand.vmem [shape: f32[16,12], index: 0, kind: input, shape index: {}]   ;;  %s239_s2 = inlined_call_operand.vmem [shape: f32[1,8], index: 2, kind: input, shape index: {}]   ;;  %s240_s4 = inlined_call_operand.vmem [shape: f32[1,8], index: 4, kind: input, shape index: {}]   ;;  %s241_s3 = inlined_call_operand.vmem [shape: f32[8,8], index: 3, kind: input, shape index: {}]   ;;  %s242_s6 = inlined_call_operand.vmem [shape: f32[1,4], index: 6, kind: input, shape index: {}]   ;;  %s243_s5 = inlined_call_operand.vmem [shape: f32[8,4], index: 5, kind: input, shape index: {}]   ;;  %s244_s7 = inlined_call_operand.vmem [shape: f32[16,4], index: 7, kind: output, shape index: {}]  }
   0x1   :  { %v29_v0 = vld [vmem:[%s237_s1 + $0x8] sm:$0xf]  ;;  %v28_v1 = vld [vmem:[%s237_s1] sm:$0xff] }
   0x2   :  { %148 = vmatpush.msk.msra.mxu0 %vm41_vm0, %v29_v0  ;;  %155 = vmatpush.msk.msra.mxu3 %vm41_vm0, %v29_v0  ;;  %v26_v2 = vld [vmem:[%s238_s0] sm:$0xff]  ;;  %v27_v3 = vld [vmem:[%s238_s0 + $0x8] sm:$0xff] }
   0x3   :  { %v70_v4 = vld [vmem:[%s241_s3] sm:$0xff] }
   0x4   :  { %60 = vmatpush.msra.mxu0 %v28_v1  ;;  %156 = vmatpush.msra.mxu3 %v28_v1  ;;  %v157_v5 = vld [vmem:[%s239_s2] ss:$0 sm:$0xff] }
   0x5   :  { %149 = vmatmul.msk.f32.vlgmr.msra.gmra.mxu0 %vm34_vm1, %v26_v2  ;;  %150 = vmatmul.msk.f32.vlgmr.msra.gmra.mxu3 %vm34_vm1, %v27_v3  ;;  %v107_v12 = vld [vmem:[%s243_s5] sm:$0xff] }
   0x6   :  { %97 = vmatpush.msra.mxu1 %v70_v4  ;;  %133 = vmatpush.msra.mxu2 %v107_v12  ;;  %v158_v13 = vld [vmem:[%s240_s4] ss:$0 sm:$0xff] }
   0x7   :  { %v159_v20 = vld [vmem:[%s242_s6] ss:$0 sm:$0xff] }
  0x82   :  { %v62_v6 = vpop.f32.mrf.mxu0 }
  0x83   :  { %v63_v7 = vadd.f32 %v157_v5, %v62_v6 }
  0x85   :  { %v68_v8 = vmax.f32 %v63_v7, 0.0 }
  0x87   :  { %151 = vmatmul.msk.f32.vlgmr.msra.gmra.mxu1 %vm75_vm2, %v68_v8 }
  0x88   :  { %v65_v9 = vpop.f32.mrf.mxu3 }
  0x89   :  { %v66_v10 = vadd.f32 %v157_v5, %v65_v9 }
  0x8b   :  { %v69_v11 = vmax.f32 %v66_v10, 0.0 }
  0x8f   :  { %152 = vmatmul.msk.f32.gmra.mxu1 %vm75_vm2, %v69_v11 }
 0x104   :  { %v99_v14 = vpop.f32.mrf.mxu1 }
 0x105   :  { %v100_v15 = vadd.f32 %v158_v13, %v99_v14 }
 0x107   :  { %v105_v16 = vmax.f32 %v100_v15, 0.0 }
 0x109   :  { %153 = vmatmul.msk.f32.vlgmr.msra.gmra.mxu2 %vm75_vm2, %v105_v16 }
 0x10c   :  { %v102_v17 = vpop.f32.mrf.mxu1 }
 0x10d   :  { %v103_v18 = vadd.f32 %v158_v13, %v102_v17 }
 0x10f   :  { %v106_v19 = vmax.f32 %v103_v18, 0.0 }
 0x111   :  { %154 = vmatmul.msk.f32.gmra.mxu2 %vm75_vm2, %v106_v19 }
 0x18c   :  { %v135_v21 = vpop.f32.mrf.mxu2 }
 0x18d   :  { %v136_v22 = vadd.f32 %v159_v20, %v135_v21 }
 0x18f   :  { %142 = vst.msk [vmem:[%s244_s7] sm:$0xff] %vm141_vm3, %v136_v22 }
 0x194   :  { %v138_v23 = vpop.f32.mrf.mxu2 }
 0x195   :  { %v139_v24 = vadd.f32 %v159_v20, %v138_v23 }
 0x197   :  { %143 = vst.msk [vmem:[%s244_s7 + $0x8] sm:$0xff] %vm141_vm3, %v139_v24 }

</bundles_post_ra>
